<compile_context>
chip_gen: v7x
topology: tpu7x:2x2x1
jax: 0.10.0
libtpu: 0.0.40
codegen_flags: <defaults>
</compile_context>

<pallas_src>
import functools

import jax
import jax.numpy as jnp
from jax.experimental import pallas as pl
from jax.experimental.pallas import tpu as pltpu


def _cond_sequential_kernel(x_ref, gp_ref, bt_ref, w_ref, b_ref, o_ref, acc_ref):
    """Grid point (b, row_tile, layer): one layer of the chain on one row tile.

    x_ref  : (1, row_tile, C)   input frames (fetched once per (b, row) tile)
    gp_ref : (1, 1, 1, C)       precomputed 1 + gamma for this (b, layer)
    bt_ref : (1, 1, 1, C)       precomputed beta for this (b, layer)
    w_ref  : (1, C, C) bf16     this layer's frame-level weight
    b_ref  : (1, 1, C) f32      this layer's bias
    o_ref  : (1, row_tile, C)   output tile (written at the last layer)
    acc_ref: (row_tile, C) f32  residual carry across the L grid axis
    """
    l = pl.program_id(2)

    @pl.when(l == 0)
    def _():
        acc_ref[...] = x_ref[0].astype(jnp.float32)

    # Hot path: bf16 MXU matmul, f32 accumulation.
    h = jnp.dot(acc_ref[...].astype(jnp.bfloat16), w_ref[0],
                preferred_element_type=jnp.float32)            # (row_tile, C)
    h = h + b_ref[0]                                            # (1, C) broadcast
    gp = gp_ref[0, 0]                                           # (1, C) = 1 + gamma
    bt = bt_ref[0, 0]                                           # (1, C) = beta
    acc_ref[...] = acc_ref[...] + jnp.tanh(h * gp + bt)         # residual in f32

    @pl.when(l == pl.num_programs(2) - 1)
    def _():
        o_ref[0] = acc_ref[...].astype(o_ref.dtype)


@functools.partial(jax.jit, static_argnames=("row_tile",))
def cond_sequential(x, cond, w, b, wg, bg, wb, bb, *, row_tile=None):
    """x: [B, T, C] f32, cond: [B, Ccond] f32 or None.

    w: [L, C, C], b: [L, C], wg/wb: [L, Ccond, C], bg/bb: [L, C].
    """
    B, T, C = x.shape
    L, Ccond, _ = wg.shape
    if cond is None:
        cond = jnp.zeros((B, Ccond), x.dtype)

    # Hoist the degenerate cond -> (gamma, beta) matmuls out of the kernel.
    cond_f32 = cond.astype(jnp.float32)
    gamma = jnp.einsum("bk,lkc->blc", cond_f32, wg) + bg[None]      # (B, L, C)
    beta = jnp.einsum("bk,lkc->blc", cond_f32, wb) + bb[None]       # (B, L, C)
    gp = (1.0 + gamma).reshape(B, L, 1, C)                          # pre-fold 1+gamma
    bt = beta.reshape(B, L, 1, C)

    w_bf16 = w.astype(jnp.bfloat16)        # bf16 MXU inputs, f32 accumulation
    b3 = b.reshape(L, 1, C).astype(jnp.float32)

    if row_tile is None:
        # 256 rows for v6e/v7x's 256-wide MXU, 128 works everywhere (v5e).
        row_tile = 256 if T % 256 == 0 else (128 if T % 128 == 0 else T)
    assert T % row_tile == 0, "T must be divisible by row_tile"

    grid = (B, T // row_tile, L)           # L innermost: weights streamed per layer

    return pl.pallas_call(
        _cond_sequential_kernel,
        out_shape=jax.ShapeDtypeStruct((B, T, C), x.dtype),
        grid_spec=pltpu.PrefetchScalarGridSpec(
            num_scalar_prefetch=0,
            grid=grid,
            in_specs=[
                pl.BlockSpec((1, row_tile, C), lambda bi, ri, li: (bi, ri, 0)),   # x
                pl.BlockSpec((1, 1, 1, C), lambda bi, ri, li: (bi, li, 0, 0)),    # 1+gamma
                pl.BlockSpec((1, 1, 1, C), lambda bi, ri, li: (bi, li, 0, 0)),    # beta
                pl.BlockSpec((1, C, C), lambda bi, ri, li: (li, 0, 0)),           # W (bf16)
                pl.BlockSpec((1, 1, C), lambda bi, ri, li: (li, 0, 0)),           # b
            ],
            out_specs=pl.BlockSpec((1, row_tile, C), lambda bi, ri, li: (bi, ri, 0)),
            scratch_shapes=[pltpu.VMEM((row_tile, C), jnp.float32)],              # residual carry
        ),
        compiler_params=pltpu.CompilerParams(
            dimension_semantics=("parallel", "parallel", "arbitrary"),
            vmem_limit_bytes=64 * 1024 * 1024,
        ),
    )(x, gp, bt, w_bf16, b3)


def cond_sequential_ref(x, cond, w, b, wg, bg, wb, bb):
    """Pure-JAX f32 reference mirroring the module semantics."""
    L = w.shape[0]
    for l in range(L):
        h = jnp.einsum("btc,cd->btd", x, w[l]) + b[l][None, None]     # (B, T, C)
        gamma = cond @ wg[l] + bg[l]                                  # (B, C)
        beta = cond @ wb[l] + bb[l]                                   # (B, C)
        x = x + jnp.tanh(h * (1.0 + gamma[:, None, :]) + beta[:, None, :])
    return x


if __name__ == "__main__":
    # Small, TPU-tile-friendly shapes (one full 128-row tile per batch element).
    B, T, C, Ccond, L = 2, 128, 128, 32, 3
    key = jax.random.PRNGKey(0)
    kx, kc, kw, kb, kwg, kbg, kwb, kbb = jax.random.split(key, 8)

    x = jax.random.normal(kx, (B, T, C), jnp.float32)
    cond = jax.random.normal(kc, (B, Ccond), jnp.float32)

    # Deterministic synthetic parameters (stacked over the L chained modules).
    w = 0.05 * jax.random.normal(kw, (L, C, C), jnp.float32)
    b = 0.05 * jax.random.normal(kb, (L, C), jnp.float32)
    wg = 0.05 * jax.random.normal(kwg, (L, Ccond, C), jnp.float32)
    bg = 0.05 * jax.random.normal(kbg, (L, C), jnp.float32)
    wb = 0.05 * jax.random.normal(kwb, (L, Ccond, C), jnp.float32)
    bb = 0.05 * jax.random.normal(kbb, (L, C), jnp.float32)

    out = cond_sequential(x, cond, w, b, wg, bg, wb, bb)
    out = jax.block_until_ready(out)

    ref = cond_sequential_ref(x, cond, w, b, wg, bg, wb, bb)
    assert out.shape == (B, T, C)
    # bf16 MXU inputs with f32 accumulation -> loosened tolerance vs f32 ref.
    assert jnp.allclose(out, ref, atol=5e-2, rtol=5e-2), (
        f"mismatch vs reference: max abs err {jnp.max(jnp.abs(out - ref))}")
    print("KERNEL_OK")
</pallas_src>

<mosaic_0001>
module attributes {stable_mosaic.version = 11 : i64} {
  func.func @_cond_sequential_kernel(%arg0: i32, %arg1: i32, %arg2: i32, %arg3: memref<1x128x128xf32, #tpu.memory_space<vmem>>, %arg4: memref<1x1x1x128xf32, #tpu.memory_space<vmem>>, %arg5: memref<1x1x1x128xf32, #tpu.memory_space<vmem>>, %arg6: memref<1x128x128xbf16, #tpu.memory_space<vmem>>, %arg7: memref<1x1x128xf32, #tpu.memory_space<vmem>>, %arg8: memref<1x128x128xf32, #tpu.memory_space<vmem>>, %arg9: memref<128x128xf32, #tpu.memory_space<vmem>>) attributes {dimension_semantics = [#tpu.dimension_semantics<parallel>, #tpu.dimension_semantics<parallel>, #tpu.dimension_semantics<arbitrary>], iteration_bounds = array<i64: 2, 1, 3>, scalar_prefetch = 0 : i64, scratch_operands = 1 : i64, tpu.core_type = #tpu.core_type<tc>, window_params = [{transform_indices = @transform_0, window_bounds = array<i64: 1, 128, 128>}, {transform_indices = @transform_1, window_bounds = array<i64: 1, 1, 1, 128>}, {transform_indices = @transform_2, window_bounds = array<i64: 1, 1, 1, 128>}, {transform_indices = @transform_3, window_bounds = array<i64: 1, 128, 128>}, {transform_indices = @transform_4, window_bounds = array<i64: 1, 1, 128>}, {transform_indices = @transform_5, window_bounds = array<i64: 1, 128, 128>}]} {
    %c0_i32 = arith.constant 0 : i32
    %0 = arith.cmpi eq, %arg2, %c0_i32 : i32
    %1 = arith.extui %0 : i1 to i32
    %c0_i32_0 = arith.constant 0 : i32
    %2 = arith.cmpi ne, %1, %c0_i32_0 : i32
    scf.if %2 {
      %c0_21 = arith.constant 0 : index
      %c0_22 = arith.constant 0 : index
      %c0_23 = arith.constant 0 : index
      %27 = vector.load %arg3[%c0_21, %c0_22, %c0_23] : memref<1x128x128xf32, #tpu.memory_space<vmem>>, vector<1x128x128xf32>
      %28 = vector.shape_cast %27 : vector<1x128x128xf32> to vector<128x128xf32>
      %c0_24 = arith.constant 0 : index
      %c0_25 = arith.constant 0 : index
      %29 = vector.load %arg9[%c0_24, %c0_25] : memref<128x128xf32, #tpu.memory_space<vmem>>, vector<128x128xf32>
      tpu.vector_store %arg9[%c0_24, %c0_25], %28 {strides = array<i32>} : memref<128x128xf32, #tpu.memory_space<vmem>>, vector<128x128xf32>,
    } else {
    }
    %c0 = arith.constant 0 : index
    %c0_1 = arith.constant 0 : index
    %3 = vector.load %arg9[%c0, %c0_1] : memref<128x128xf32, #tpu.memory_space<vmem>>, vector<128x128xf32>
    %4 = arith.truncf %3 : vector<128x128xf32> to vector<128x128xbf16>
    %c0_2 = arith.constant 0 : index
    %c0_3 = arith.constant 0 : index
    %c0_4 = arith.constant 0 : index
    %5 = vector.load %arg6[%c0_2, %c0_3, %c0_4] : memref<1x128x128xbf16, #tpu.memory_space<vmem>>, vector<1x128x128xbf16>
    %6 = vector.shape_cast %5 : vector<1x128x128xbf16> to vector<128x128xbf16>
    %cst = arith.constant dense<0.000000e+00> : vector<128x128xf32>
    %7 = tpu.matmul %4, %6, %cst {dimension_numbers = #tpu.dot_dimension_numbers<[1], [0], [0], [1], [0, 0, 1, 1], [], []>} : vector<128x128xbf16>, vector<128x128xbf16>, vector<128x128xf32> -> vector<128x128xf32>
    %c0_5 = arith.constant 0 : index
    %c0_6 = arith.constant 0 : index
    %c0_7 = arith.constant 0 : index
    %8 = vector.load %arg7[%c0_5, %c0_6, %c0_7] : memref<1x1x128xf32, #tpu.memory_space<vmem>>, vector<1x1x128xf32>
    %9 = vector.shape_cast %8 : vector<1x1x128xf32> to vector<1x128xf32>
    %10 = vector.broadcast %9 : vector<1x128xf32> to vector<128x128xf32>
    %11 = arith.addf %7, %10 : vector<128x128xf32>
    %c0_8 = arith.constant 0 : index
    %c0_9 = arith.constant 0 : index
    %c0_10 = arith.constant 0 : index
    %c0_11 = arith.constant 0 : index
    %12 = vector.load %arg4[%c0_8, %c0_9, %c0_10, %c0_11] : memref<1x1x1x128xf32, #tpu.memory_space<vmem>>, vector<1x1x1x128xf32>
    %13 = vector.shape_cast %12 : vector<1x1x1x128xf32> to vector<1x128xf32>
    %c0_12 = arith.constant 0 : index
    %c0_13 = arith.constant 0 : index
    %c0_14 = arith.constant 0 : index
    %c0_15 = arith.constant 0 : index
    %14 = vector.load %arg5[%c0_12, %c0_13, %c0_14, %c0_15] : memref<1x1x1x128xf32, #tpu.memory_space<vmem>>, vector<1x1x1x128xf32>
    %15 = vector.shape_cast %14 : vector<1x1x1x128xf32> to vector<1x128xf32>
    %c0_16 = arith.constant 0 : index
    %c0_17 = arith.constant 0 : index
    %16 = vector.load %arg9[%c0_16, %c0_17] : memref<128x128xf32, #tpu.memory_space<vmem>>, vector<128x128xf32>
    %17 = vector.broadcast %13 : vector<1x128xf32> to vector<128x128xf32>
    %18 = arith.mulf %11, %17 : vector<128x128xf32>
    %19 = vector.broadcast %15 : vector<1x128xf32> to vector<128x128xf32>
    %20 = arith.addf %18, %19 : vector<128x128xf32>
    %21 = math.tanh %20 : vector<128x128xf32>
    %22 = arith.addf %16, %21 : vector<128x128xf32>
    %c0_18 = arith.constant 0 : index
    %c0_19 = arith.constant 0 : index
    %23 = vector.load %arg9[%c0_18, %c0_19] : memref<128x128xf32, #tpu.memory_space<vmem>>, vector<128x128xf32>
    tpu.vector_store %arg9[%c0_18, %c0_19], %22 {strides = array<i32>} : memref<128x128xf32, #tpu.memory_space<vmem>>, vector<128x128xf32>,
    %c2_i32 = arith.constant 2 : i32
    %24 = arith.cmpi eq, %arg2, %c2_i32 : i32
    %25 = arith.extui %24 : i1 to i32
    %c0_i32_20 = arith.constant 0 : i32
    %26 = arith.cmpi ne, %25, %c0_i32_20 : i32
    scf.if %26 {
      %c0_21 = arith.constant 0 : index
      %c0_22 = arith.constant 0 : index
      %27 = vector.load %arg9[%c0_21, %c0_22] : memref<128x128xf32, #tpu.memory_space<vmem>>, vector<128x128xf32>
      %c0_23 = arith.constant 0 : index
      %c0_24 = arith.constant 0 : index
      %c0_25 = arith.constant 0 : index
      %28 = vector.load %arg8[%c0_23, %c0_24, %c0_25] : memref<1x128x128xf32, #tpu.memory_space<vmem>>, vector<1x128x128xf32>
      %29 = vector.shape_cast %28 : vector<1x128x128xf32> to vector<128x128xf32>
      %30 = vector.shape_cast %27 : vector<128x128xf32> to vector<1x128x128xf32>
      tpu.vector_store %arg8[%c0_23, %c0_24, %c0_25], %30 {strides = array<i32>} : memref<1x128x128xf32, #tpu.memory_space<vmem>>, vector<1x128x128xf32>,
    } else {
    }
    return
  }
  func.func @transform_0(%arg0: i32, %arg1: i32, %arg2: i32) -> (i32, i32, i32) {
    %c0_i32 = arith.constant 0 : i32
    %c0_i32_0 = arith.constant 0 : i32
    return %arg0, %arg1, %c0_i32 : i32, i32, i32
  }
  func.func @transform_1(%arg0: i32, %arg1: i32, %arg2: i32) -> (i32, i32, i32, i32) {
    %c0_i32 = arith.constant 0 : i32
    %c0_i32_0 = arith.constant 0 : i32
    %c0_i32_1 = arith.constant 0 : i32
    return %arg0, %arg2, %c0_i32, %c0_i32_0 : i32, i32, i32, i32
  }
  func.func @transform_2(%arg0: i32, %arg1: i32, %arg2: i32) -> (i32, i32, i32, i32) {
    %c0_i32 = arith.constant 0 : i32
    %c0_i32_0 = arith.constant 0 : i32
    %c0_i32_1 = arith.constant 0 : i32
    return %arg0, %arg2, %c0_i32, %c0_i32_0 : i32, i32, i32, i32
  }
  func.func @transform_3(%arg0: i32, %arg1: i32, %arg2: i32) -> (i32, i32, i32) {
    %c0_i32 = arith.constant 0 : i32
    %c0_i32_0 = arith.constant 0 : i32
    %c0_i32_1 = arith.constant 0 : i32
    return %arg2, %c0_i32, %c0_i32_0 : i32, i32, i32
  }
  func.func @transform_4(%arg0: i32, %arg1: i32, %arg2: i32) -> (i32, i32, i32) {
    %c0_i32 = arith.constant 0 : i32
    %c0_i32_0 = arith.constant 0 : i32
    %c0_i32_1 = arith.constant 0 : i32
    return %arg2, %c0_i32, %c0_i32_0 : i32, i32, i32
  }
  func.func @transform_5(%arg0: i32, %arg1: i32, %arg2: i32) -> (i32, i32, i32) {
    %c0_i32 = arith.constant 0 : i32
    %c0_i32_0 = arith.constant 0 : i32
    return %arg0, %arg1, %c0_i32 : i32, i32, i32
  }
}

</mosaic_0001>

<bundles_post_ra>
// kernel: cond_sequential.1
= control target key start
LH: loop header
LB: loop body
LE: loop exit
PB: predicated region body
PF: predicated region fallthrough
CT: control target
= control target key end

     0   :  { %s2249_s0 = inlined_call_operand.hbm [shape: f32[2,128,128], index: 0, kind: input, shape index: {}]   ;;  %s2250_s1 = inlined_call_operand.hbm [shape: f32[2,3,1,128], index: 1, kind: input, shape index: {}]   ;;  %s2251_s2 = inlined_call_operand.hbm [shape: f32[2,3,1,128], index: 2, kind: input, shape index: {}]   ;;  %s2252_s3 = inlined_call_operand.hbm [shape: bf16[3,128,128], index: 3, kind: input, shape index: {}]   ;;  %s2253_s4 = inlined_call_operand.hbm [shape: f32[3,1,128], index: 4, kind: input, shape index: {}]   ;;  %s2254_s5 = inlined_call_operand.hbm [shape: f32[2,128,128], index: 5, kind: output, shape index: {}]  }
   0x1   :  { %2283 = sst [smem:[#allocation32_spill]] %s2249_s0 }
   0x2   :  { %2284 = sst [smem:[#allocation33_spill]] %s2250_s1 }
   0x3   :  { %2285 = sst [smem:[#allocation34_spill]] %s2252_s3 }
   0x4   :  { %2286 = sst [smem:[#allocation35_spill]] %s2253_s4 }
   0x5   :  { %2287 = sst [smem:[#allocation36_spill]] %s2254_s5 }
   0x6   :  { %10 = vsyncpa [#allocation4], 0 }
   0x7   :  { %12 = vsyncpa [#allocation4 + $0x1], 0 }
   0x8   :  { %13 = vsyncpa [#allocation7], 0 }
   0x9   :  { %15 = vsyncpa [#allocation7 + $0x1], 0 }
   0xa   :  { %16 = vsyncpa [#allocation10], 0 }
   0xb   :  { %18 = vsyncpa [#allocation10 + $0x1], 0 }
   0xc   :  { %19 = vsyncpa [#allocation5], 0 }
   0xd   :  { %21 = vsyncpa [#allocation5 + $0x1], 0  ;;  %s1607_s18 = smov 0   ;;  %s1609_s19 = smov 0  }
   0xe   :  { %s1611_s20 = smov 0   ;;  %s1613_s21 = smov 0  }
   0xf   :  { %s1615_s22 = smov 0   ;;  %s1617_s23 = smov 0  }
  0x10   :  { %s1619_s24 = smov 0   ;;  %s1621_s25 = smov 0  }
  0x11   :  { %s1623_s26 = smov 0   ;;  %s1625_s27 = smov 0  }
  0x12   :  { %s1627_s28 = smov 0   ;;  %s1629_s29 = smov 0  }
  0x13   :  { %s1631_s30 = smov 0   ;;  %s1633_s6 = smov 0  }
  0x14 LB: > { %2288 = sst [smem:[#allocation17_spill]] %s1527_s22  ;;  %s1676_s7 = sadd.s32 4294967295, %s1563_s6   ;;  %s1563_s6 = sphi %s1633_s6, %s27_s6   ;;  %s1559_s30 = sphi %s1631_s30, %s2358_s30   ;;  %s1555_s29 = sphi %s1629_s29, %s2367_s29   ;;  %s1551_s28 = sphi %s1627_s28, %s2356_s28   ;;  %s1547_s27 = sphi %s1625_s27, %s2366_s27   ;;  %s1543_s26 = sphi %s1623_s26, %s2355_s26   ;;  %s1539_s25 = sphi %s1621_s25, %s2365_s25   ;;  %s1535_s24 = sphi %s1619_s24, %s2364_s24   ;;  %s1531_s23 = sphi %s1617_s23, %s2363_s23   ;;  %s1527_s22 = sphi %s1615_s22, %s2362_s22   ;;  %s1523_s21 = sphi %s1613_s21, %s2352_s21   ;;  %s1519_s20 = sphi %s1611_s20, %s2361_s20   ;;  %s1515_s19 = sphi %s1609_s19, %s2360_s19   ;;  %s1511_s18 = sphi %s1607_s18, %s2359_s18  }
  0x15   : > { %2289 = sst [smem:[#allocation18_spill]] %s1535_s24  ;;  %s39_s8 = sadd.s32 1, %s1555_s29 }
  0x16   : > { %2290 = sst [smem:[#allocation19_spill]] %s1543_s26  ;;  %p40_p0 = scmp.ge.s32.totalorder %s39_s8, 3 }
  0x17   : > { %2291 = sst [smem:[#allocation20_spill]] %s1547_s27  ;;  %s46_s9 = sadd.s32 1, %s1559_s30 }
  0x18   : > { %2292 = sst [smem:[#allocation21_spill]] %s1551_s28  ;;  %p2265_p1 = scmp.eq.s32.totalorder %s1563_s6, 0 }
  0x19   : > { %2293 = sst [smem:[#allocation22_spill]] %s1559_s30  ;;  %p2264_p2 = scmp.eq.s32.totalorder %s1676_s7, 0 }
  0x1a   : > { %2294 = sst [smem:[#allocation23_spill]] %s1563_s6  ;;  %s2369_s8 = smov (%p40_p0, %s39_s8), 0 }
  0x1b   : > { %2295 = sst [smem:[#allocation24_spill]] %s2369_s8  ;;  %s2371_s9 = smov (!%p40_p0, %s46_s9), %s1559_s30 }
  0x1c   : > { %s1687_s10 = ssub.s32 %s1555_s29, %s2369_s8  ;;  %s83_s11 = sadd.s32 1, %s1531_s23 }
  0x1d   : > { %p48_p3 = scmp.ge.s32.totalorder %s2371_s9, 2  ;;  %p90_p4 = scmp.ne.s32.totalorder %s1531_s23, %s1527_s22 }
  0x1e   : > { %p96_p5 = scmp.ne.s32.totalorder %s1527_s22, %s1523_s21  ;;  %p2263_p11 = scmp.lt.s32.totalorder %s1563_s6, 6 }
  0x1f   : > { %s2373_s9 = smov (%p48_p3, %s2371_s9), 0  ;;  %p1698_p7 = por %p90_p4, %p2265_p1 }
  0x20   : > { %2296 = sst [smem:[#allocation25_spill]] %s2373_s9  ;;  %p1704_p8 = por %p96_p5, %p2264_p2 }
  0x21   : > { %s1710_s14 = ssub.s32 %s1559_s30, %s2373_s9  ;;  %s2260_s17 = sand.u32 1, %s1531_s23  }
  0x22   : > { %s2298_s13 = scalar_select %p1704_p8, 1, 0 }
  0x23   : > { %s80_s15 = sor.u32 %s1687_s10, %s1710_s14  ;;  %s1065_s8 = smul.u32 3, %s1559_s30 }
  0x24   : > { %2299 = sst [smem:[#allocation26_spill]] %s2298_s13  ;;  %p81_p10 = scmp.eq.s32.totalorder %s80_s15, 0 }
  0x25   : > { %s254_s5 = scalar_lea.vmem [#allocation6], %s2260_s17  ;;  %p1730_p12 = pnand %p2263_p11, %p1698_p7 }
  0x26   : > { %s1719_s21 = scalar_select %p81_p10, %s1531_s23, %s83_s11  }
  0x27   : > { %s263_s28 = sshll.u32 %s254_s5, 4  ;;  %s259_s15 = sadd.s32 %s1555_s29, %s1065_s8  ;;  %s1724_s28 = int_to_ptr.vmem [resolvable:$true] %s263_s28 }
  0x28   : > { %2300 = sst [smem:[#allocation27_spill]] %s1719_s21  ;;  %s970_s27 = sshll.u32 %s259_s15, 4 }
  0x29   : > { %s2302_s1 = sld [smem:[#allocation33_spill]]  ;;  %s1743_s5 = scalar_lea.hbm %s2251_s2, %s970_s27 }
  0x2a   : > { %s2303_s12 = sand.u32 1, %s1563_s6   ;;  %p2267_p0 = pneg %p1730_p12 }
  0x2b   : > { %s1747_s22 = scalar_lea.sflag [#allocation7], %s2303_s12 }
  0x2f   : > { %s1738_s11 = scalar_lea.hbm %s2302_s1, %s970_s27  ;;  %s1264_s16 = scalar_lea.hbm %s2302_s1, 96 }
  0x30   : > { %s1259_s4 = scalar_lea.hbm %s1738_s11, 16  ;;  %p1265_p5 = scmp.lt.u32.totalorder %s1738_s11, %s2302_s1 }
  0x31   : > { %p1260_p13 = scmp.ne.s32.totalorder %s1738_s11, %s1259_s4  ;;  %p1266_p7 = scmp.lt.u32.totalorder %s1264_s16, %s1259_s4 }
  0x32   : > { %p1268_p9 = scmp.lt.u32.totalorder %s1259_s4, %s1738_s11 }
  0x33   : > { %p1262_p3 = pnand %p2267_p0, %p1260_p13  ;;  %p1267_p10 = por %p1266_p7, %p1265_p5 }
  0x35   : > { %p1263_p4 = pneg %p1262_p3  ;;  %p1269_p11 = por %p1268_p9, %p1267_p10 }
  0x37   : > { %p1270_p2 = pnand %p1269_p11, %p1263_p4 }
  0x39   : > { %1273 = shalt.err (!%p1270_p2)
}
  0x3a   : > { %s1274_s27 = scalar_lea.vmem %s1724_s28, 16  ;;  %s1565_s15 = smov [#allocation6]  }
  0x3b   : > { %p1275_p13 = scmp.ne.s32.totalorder %s1724_s28, %s1274_s27  ;;  %s1279_s12 = sshll.u32 %s1565_s15, 4  ;;  %s1280_s12 = int_to_ptr.vmem [resolvable:$false] %s1279_s12 }
  0x3c   : > { %s1281_s8 = scalar_lea.vmem %s1280_s12, 32  ;;  %p1282_p6 = scmp.lt.s32.totalorder %s1724_s28, %s1280_s12 }
  0x3d   : > { %p1277_p3 = pnand %p1275_p13, %p2267_p0  ;;  %p1283_p5 = scmp.lt.s32.totalorder %s1281_s8, %s1274_s27 }
  0x3f   : > { %p1278_p1 = pneg %p1277_p3  ;;  %p1284_p7 = por %p1283_p5, %p1282_p6 }
  0x41   : > { %p1285_p9 = pnand %p1284_p7, %p1278_p1 }
  0x43   : > { %1288 = shalt.err (!%p1285_p9)
}
  0x44   : > { %1085 = dma.hbm_to_vmem [thread:$0]  (!%p1730_p12), %s1738_s11, 16, %s1724_s28, %s1747_s22  }
  0x45   : > { %p976_p1 = scmp.ge.s32.totalorder %s1563_s6, 1  ;;  %p325_p2 = scmp.lt.s32.totalorder %s1563_s6, 7 }
  0x46   : > { %s137_s13 = sadd.s32 1, %s1519_s20  ;;  %p144_p11 = scmp.ne.s32.totalorder %s1519_s20, %s1515_s19 }
  0x47   : > { %p1777_p6 = pnand %p976_p1, %p325_p2  ;;  %p2305_p4 = scmp.eq.s32.totalorder %s1687_s10, 0 }
  0x48   : > { %p2307_p10 = scmp.eq.s32.totalorder %s1563_s6, 0  ;;  %p150_p3 = scmp.ne.s32.totalorder %s1515_s19, %s1511_s18 }
  0x49   : > { %s2304_s4 = scalar_select %p1777_p6, 1, 0 }
  0x4a   : > { %s1787_s16 = scalar_select %p2305_p4, %s1519_s20, %s137_s13  }
  0x4b   : > { %p146_p13 = por %p144_p11, %p2307_p10  ;;  %s2266_s17 = sand.u32 1, %s1519_s20  }
  0x4c   : > { %2306 = sst [smem:[#allocation28_spill]] %s1787_s16  ;;  %s999_s21 = sshll.u32 %s1555_s29, 10 }
  0x4d   : > { %p2308_p5 = scmp.eq.s32.totalorder %s1676_s7, 0  ;;  %s972_s11 = sshll.u32 %s2266_s17, 6 }
  0x4e   : > { %s2310_s3 = sld [smem:[#allocation34_spill]]  ;;  %s293_s10 = scalar_lea.vmem [#allocation9], %s972_s11 }
  0x4f   : > { %p1797_p7 = por %p150_p3, %p2308_p5  ;;  %s300_s18 = sshll.u32 %s293_s10, 4  ;;  %s1814_s18 = int_to_ptr.vmem [resolvable:$true] %s300_s18 }
  0x50   : > { %p2311_p9 = scmp.lt.s32.totalorder %s1563_s6, 6  ;;  %s2313_s13 = sand.u32 1, %s1563_s6  }
  0x51   : > { %s2309_s28 = scalar_select %p1797_p7, 1, 0 }
  0x52   : > { %p1810_p1 = pnand %p2311_p9, %p146_p13  ;;  %s1818_s17 = scalar_lea.sflag [#allocation10], %s2313_s13 }
  0x54   : > { %s1806_s12 = scalar_lea.hbm %s2310_s3, %s999_s21  ;;  %p2272_p11 = pneg %p1810_p1 }
  0x55   : > { %s2312_s8 = scalar_select %p1810_p1, 1, 0 }
  0x56   : > { %s1289_s21 = scalar_lea.hbm %s1806_s12, 1024  ;;  %s1294_s15 = scalar_lea.hbm %s2310_s3, 3072 }
  0x57   : > { %p1290_p2 = scmp.ne.s32.totalorder %s1806_s12, %s1289_s21  ;;  %p1295_p13 = scmp.lt.u32.totalorder %s1806_s12, %s2310_s3 }
  0x58   : > { %p1296_p3 = scmp.lt.u32.totalorder %s1294_s15, %s1289_s21  ;;  %p1298_p9 = scmp.lt.u32.totalorder %s1289_s21, %s1806_s12 }
  0x59   : > { %p1292_p4 = pnand %p2272_p11, %p1290_p2 }
  0x5a   : > { %p1297_p5 = por %p1296_p3, %p1295_p13 }
  0x5b   : > { %p1293_p10 = pneg %p1292_p4 }
  0x5c   : > { %p1299_p0 = por %p1298_p9, %p1297_p5 }
  0x5e   : > { %p1300_p7 = pnand %p1299_p0, %p1293_p10 }
  0x60   : > { %1303 = shalt.err (!%p1300_p7)
}
  0x61   : > { %s1304_s13 = scalar_lea.vmem %s1814_s18, 1024  ;;  %s1566_s11 = smov [#allocation9]  }
  0x62   : > { %p1305_p2 = scmp.ne.s32.totalorder %s1814_s18, %s1304_s13  ;;  %s1309_s27 = sshll.u32 %s1566_s11, 4  ;;  %s1310_s27 = int_to_ptr.vmem [resolvable:$false] %s1309_s27 }
  0x63   : > { %s1311_s1 = scalar_lea.vmem %s1310_s27, 2048  ;;  %p1312_p6 = scmp.lt.s32.totalorder %s1814_s18, %s1310_s27 }
  0x64   : > { %p1307_p4 = pnand %p1305_p2, %p2272_p11  ;;  %p1313_p13 = scmp.lt.s32.totalorder %s1311_s1, %s1304_s13 }
  0x66   : > { %p1308_p8 = pneg %p1307_p4  ;;  %p1314_p3 = por %p1313_p13, %p1312_p6 }
  0x68   : > { %p1315_p5 = pnand %p1314_p3, %p1308_p8 }
  0x6a   : > { %1318 = shalt.err (!%p1315_p5)
}
  0x6b   : > { %s1567_s21 = smov 64   ;;  %s1568_s15 = smov 4  }
  0x6c   : > { %1091 = dma.hbm_to_vmem [thread:$0]  (!%p1810_p1), %s1806_s12, 1024, %s1814_s18, %s1818_s17, %s1567_s21, %s1567_s21, %s1568_s15  }
  0x6d   : > { %s964_s10 = sadd.s32 4294967294, %s1563_s6   ;;  %s55_s13 = sadd.s32 1, %s1543_s26 }
  0x6e   : > { %p2314_p8 = scmp.eq.s32.totalorder %s1710_s14, 0  ;;  %p62_p0 = scmp.ne.s32.totalorder %s1543_s26, %s1539_s25 }
  0x6f   : > { %p68_p6 = scmp.ne.s32.totalorder %s1539_s25, %s1535_s24  ;;  %p202_p7 = scmp.eq.s32.totalorder %s1676_s7, 5 }
  0x70   : > { %s1851_s11 = scalar_select %p2314_p8, %s1543_s26, %s55_s13  }
  0x71   : > { %p208_p10 = scmp.eq.s32.totalorder %s964_s10, 5  ;;  %p2316_p9 = scmp.eq.s32.totalorder %s1563_s6, 0 }
  0x72   : > { %2315 = sst [smem:[#allocation29_spill]] %s1851_s11  ;;  %p2317_p4 = scmp.eq.s32.totalorder %s1676_s7, 0 }
  0x73   : > { %p64_p2 = por %p2316_p9, %p62_p0  ;;  %p1866_p3 = por %p202_p7, %p62_p0 }
  0x74   : > { %p1862_p13 = por %p2317_p4, %p68_p6  ;;  %p1870_p5 = por %p208_p10, %p68_p6 }
  0x75   : > { %s2319_s1 = scalar_select %p1866_p3, 1, 0 }
  0x76   : > { %s2318_s27 = scalar_select %p1862_p13, 1, 0 }
  0x77   : > { %2320 = sst [smem:[#allocation30_spill]] %s2319_s1  ;;  %s228_s12 = sand.u32 1, %s1543_s26  }
  0x78   : > { %s2321_s14 = scalar_select %p1870_p5, 1, 0 }
  0x79   : > { %s998_s18 = sshll.u32 %s1559_s30, 11  ;;  %s967_s21 = sshll.u32 %s228_s12, 7 }
  0x7a   : > { %2322 = sst [smem:[#allocation31_spill]] %s2321_s14  ;;  %s2323_s0 = sld [smem:[#allocation32_spill]] }
  0x7b   : > { %s232_s3 = scalar_lea.vmem [#allocation3], %s967_s21  ;;  %p2324_p8 = scmp.lt.s32.totalorder %s1563_s6, 6 }
  0x7c   : > { %s241_s11 = sshll.u32 %s232_s3, 4  ;;  %s1889_s30 = scalar_lea.sflag [#allocation4], %s228_s12  ;;  %s1887_s11 = int_to_ptr.vmem [resolvable:$true] %s241_s11 }
  0x7d   : > { %p1883_p0 = pnand %p2324_p8, %p64_p2 }
  0x7f   : > { %p1321_p7 = pneg %p1883_p0 }
  0x80   : > { %s1879_s13 = scalar_lea.hbm %s2323_s0, %s998_s18  ;;  %s1324_s21 = scalar_lea.hbm %s2323_s0, 4096 }
  0x81   : > { %s1319_s15 = scalar_lea.hbm %s1879_s13, 2048  ;;  %p1325_p2 = scmp.lt.u32.totalorder %s1879_s13, %s2323_s0 }
  0x82   : > { %p1320_p6 = scmp.ne.s32.totalorder %s1879_s13, %s1319_s15  ;;  %p1326_p4 = scmp.lt.u32.totalorder %s1324_s21, %s1319_s15 }
  0x83   : > { %p1328_p11 = scmp.lt.u32.totalorder %s1319_s15, %s1879_s13 }
  0x84   : > { %p1322_p10 = pnand %p1321_p7, %p1320_p6  ;;  %p1327_p8 = por %p1326_p4, %p1325_p2 }
  0x86   : > { %p1323_p9 = pneg %p1322_p10  ;;  %p1329_p5 = por %p1328_p11, %p1327_p8 }
  0x88   : > { %p1330_p3 = pnand %p1329_p5, %p1323_p9 }
  0x8a   : > { %1333 = shalt.err (!%p1330_p3)
}
  0x8b   : > { %s1334_s12 = scalar_lea.vmem %s1887_s11, 2048  ;;  %s1569_s3 = smov [#allocation3]  }
  0x8c   : > { %p1335_p6 = scmp.ne.s32.totalorder %s1887_s11, %s1334_s12  ;;  %s1339_s18 = sshll.u32 %s1569_s3, 4  ;;  %s1340_s18 = int_to_ptr.vmem [resolvable:$false] %s1339_s18 }
  0x8d   : > { %s1341_s26 = scalar_lea.vmem %s1340_s18, 4096  ;;  %p1342_p1 = scmp.lt.s32.totalorder %s1887_s11, %s1340_s18 }
  0x8e   : > { %p1337_p10 = pnand %p1335_p6, %p1321_p7  ;;  %p1343_p2 = scmp.lt.s32.totalorder %s1341_s26, %s1334_s12 }
  0x90   : > { %p1338_p13 = pneg %p1337_p10  ;;  %p1344_p4 = por %p1343_p2, %p1342_p1 }
  0x92   : > { %p1345_p11 = pnand %p1344_p4, %p1338_p13 }
  0x94   : > { %1348 = shalt.err (!%p1345_p11)
}
  0x95   : > { %s1570_s15 = smov 128   ;;  %s1571_s21 = smov 8  }
  0x96   : > { %1082 = dma.hbm_to_vmem [thread:$0]  (!%p1883_p0), %s1879_s13, 2048, %s1887_s11, %s1889_s30, %s1570_s15, %s1570_s15, %s1571_s21  }
  0x97   : > { %s2326_s10 = sand.u32 1, %s1531_s23   ;;  %s975_s18 = sshll.u32 %s1555_s29, 4 }
  0x98   : > { %s273_s12 = scalar_lea.vmem [#allocation8], %s2326_s10  ;;  %s1349_s26 = scalar_lea.hbm %s1743_s5, 16 }
  0x99   : > { %s282_s3 = sshll.u32 %s273_s12, 4  ;;  %p1350_p1 = scmp.ne.s32.totalorder %s1743_s5, %s1349_s26  ;;  %s283_s3 = int_to_ptr.vmem [resolvable:$true] %s282_s3 }
  0x9a   : > { %p2327_p13 = pneg %p1730_p12  ;;  %s1354_s24 = scalar_lea.hbm %s2251_s2, 96 }
  0x9b   : > { %p1355_p7 = scmp.lt.u32.totalorder %s1743_s5, %s2251_s2  ;;  %p1356_p0 = scmp.lt.u32.totalorder %s1354_s24, %s1349_s26 }
  0x9c   : > { %p1352_p3 = pnand %p1350_p1, %p2327_p13  ;;  %p1358_p8 = scmp.lt.u32.totalorder %s1349_s26, %s1743_s5 }
  0x9d   : > { %p1357_p9 = por %p1356_p0, %p1355_p7 }
  0x9e   : > { %p1353_p5 = pneg %p1352_p3 }
  0x9f   : > { %p1359_p6 = por %p1358_p8, %p1357_p9 }
  0xa1   : > { %p1360_p10 = pnand %p1359_p6, %p1353_p5 }
  0xa3   : > { %1363 = shalt.err (!%p1360_p10)
}
  0xa4   : > { %s1364_s30 = scalar_lea.vmem %s283_s3, 16  ;;  %p2328_p4 = pmov %p2327_p13 }
  0xa5   : > { %p1365_p2 = scmp.ne.s32.totalorder %s283_s3, %s1364_s30  ;;  %s1572_s16 = smov [#allocation8]  }
  0xa6   : > { %s1369_s0 = sshll.u32 %s1572_s16, 4  ;;  %s1370_s0 = int_to_ptr.vmem [resolvable:$false] %s1369_s0 }
  0xa7   : > { %p1367_p11 = pnand %p1365_p2, %p2328_p4  ;;  %s1371_s11 = scalar_lea.vmem %s1370_s0, 32 }
  0xa8   : > { %p1372_p13 = scmp.lt.s32.totalorder %s283_s3, %s1370_s0  ;;  %p1373_p3 = scmp.lt.s32.totalorder %s1371_s11, %s1364_s30 }
  0xa9   : > { %p1368_p1 = pneg %p1367_p11 }
  0xaa   : > { %p1374_p0 = por %p1373_p3, %p1372_p13 }
  0xac   : > { %p1375_p7 = pnand %p1374_p0, %p1368_p1 }
  0xae   : > { %1378 = shalt.err (!%p1375_p7)
}
  0xaf   : > { %1088 = dma.hbm_to_vmem [thread:$0]  (!%p1730_p12), %s1743_s5, 16, %s283_s3, %s1747_s22  }
  0xb0   : > { %s2329_s1 = sld [smem:[#allocation35_spill]]  ;;  %s2330_s13 = sand.u32 1, %s1519_s20  }
  0xb1   : > { %s313_s15 = scalar_lea.vmem [#allocation11], %s2330_s13  ;;  %p2331_p9 = scmp.ne.s32.totalorder %s2312_s8, 0 }
  0xb2   : > { %s320_s21 = sshll.u32 %s313_s15, 4  ;;  %s321_s21 = int_to_ptr.vmem [resolvable:$true] %s320_s21 }
  0xb3   : > { %p2332_p8 = pneg %p2331_p9 }
  0xb6   : > { %s1943_s14 = scalar_lea.hbm %s2329_s1, %s975_s18  ;;  %s1384_s5 = scalar_lea.hbm %s2329_s1, 48 }
  0xb7   : > { %s1379_s10 = scalar_lea.hbm %s1943_s14, 16  ;;  %p1385_p12 = scmp.lt.u32.totalorder %s1943_s14, %s2329_s1 }
  0xb8   : > { %p1380_p5 = scmp.ne.s32.totalorder %s1943_s14, %s1379_s10  ;;  %p1386_p2 = scmp.lt.u32.totalorder %s1384_s5, %s1379_s10 }
  0xb9   : > { %p1388_p11 = scmp.lt.u32.totalorder %s1379_s10, %s1943_s14 }
  0xba   : > { %p1382_p6 = pnand %p1380_p5, %p2332_p8  ;;  %p1387_p4 = por %p1386_p2, %p1385_p12 }
  0xbc   : > { %p1383_p10 = pneg %p1382_p6  ;;  %p1389_p1 = por %p1388_p11, %p1387_p4 }
  0xbe   : > { %p1390_p13 = pnand %p1389_p1, %p1383_p10 }
  0xc0   : > { %1393 = shalt.err (!%p1390_p13)
}
  0xc1   : > { %s1394_s18 = scalar_lea.vmem %s321_s21, 16  ;;  %p2333_p0 = pmov %p2332_p8 }
  0xc2   : > { %p1395_p3 = scmp.ne.s32.totalorder %s321_s21, %s1394_s18  ;;  %s1573_s26 = smov [#allocation11]  }
  0xc3   : > { %s1399_s30 = sshll.u32 %s1573_s26, 4  ;;  %s1400_s30 = int_to_ptr.vmem [resolvable:$false] %s1399_s30 }
  0xc4   : > { %p1397_p7 = pnand %p1395_p3, %p2333_p0  ;;  %s1401_s16 = scalar_lea.vmem %s1400_s30, 32 }
  0xc5   : > { %p1402_p8 = scmp.lt.s32.totalorder %s321_s21, %s1400_s30  ;;  %p1403_p6 = scmp.lt.s32.totalorder %s1401_s16, %s1394_s18 }
  0xc6   : > { %p1398_p5 = pneg %p1397_p7 }
  0xc7   : > { %p1404_p2 = por %p1403_p6, %p1402_p8 }
  0xc9   : > { %p1405_p12 = pnand %p1404_p2, %p1398_p5 }
  0xcb   : > { %1408 = shalt.err (!%p1405_p12)
}
  0xcc   : > { %1094 = dma.hbm_to_vmem [thread:$0]  (!%p2331_p9), %s1943_s14, 16, %s321_s21, %s1818_s17  }
  0xcd   : > { %p2334_p10 = scmp.ne.s32.totalorder %s2304_s4, 0 }
  0xce   : > { %s1970_s0 = sand.u32 (!%p2334_p10), 1, %s1539_s25   ;;  %p2335_p4 = scmp.ne.s32.totalorder (!%p2334_p10), %s2318_s27, 0 }
  0xcf   : > { %329 = sbr.rel (%p2334_p10) target bundleno = 562 (0x232), region = 40  ;;  %s977_s11 = sshll.u32 (!%p2334_p10), %s1970_s0, 7 }
  0xd0   : > { %s332_s24 = scalar_lea.sflag (!%p2334_p10), [#allocation4], %s1970_s0  ;;  %s1974_s6 = scalar_lea.vmem (!%p2334_p10), [#allocation3], %s977_s11 }
  0xd6   : > { %1494 = dma.done.wait (%p2335_p4), %s332_s24, 2048  }
  0xd7   : > { %1496 = vsyncadd (%p2335_p4), %s332_s24, 4294965248  ;;  %s2336_s17 = sld [smem:[#allocation17_spill]]  ;;  %s2337_s8 = sld [smem:[#allocation26_spill]] }
  0xd8   : > { %s340_s4 = sand.u32 1, %s1676_s7  }
  0xd9   : > { %s341_s13 = scalar_lea.sflag [#allocation7], %s340_s4 }
  0xdd   : > { %s342_s14 = sand.u32 1, %s2336_s17   ;;  %p2338_p9 = scmp.ne.s32.totalorder %s2337_s8, 0 }
  0xde   : > { %s1982_s15 = scalar_lea.vmem [#allocation6], %s342_s14 }
  0xdf   : > { %1498 = dma.done.wait (%p2338_p9), %s341_s13, 32  }
  0xe0   : > { %1500 = vsyncadd (%p2338_p9), %s341_s13, 4294967264  ;;  %s358_s21 = sand.u32 1, %s1515_s19   ;;  %s1989_s22 = scalar_lea.vmem [#allocation8], %s342_s14 }
  0xe1   : > { %s978_s10 = sshll.u32 %s358_s21, 6  ;;  %s357_s27 = scalar_lea.sflag [#allocation10], %s340_s4 }
  0xe2   : > { %s1991_s9 = scalar_lea.vmem [#allocation9], %s978_s10  ;;  %p2339_p11 = scmp.ne.s32.totalorder %s2309_s28, 0 }
  0xe4   : > { %1502 = dma.done.wait (%p2339_p11), %s357_s27, 1040  }
  0xe5   : > { %1504 = vsyncadd (%p2339_p11), %s357_s27, 4294966256  ;;  %s1997_s7 = scalar_lea.vmem [#allocation11], %s358_s21  ;;  %s1999_s5 = scalar_lea.vmem [#allocation12], %s977_s11 }
  0xe6   : > { %s2340_s12 = sld [smem:[#allocation20_spill]] }
  0xec   : > { %p980_p1 = scmp.ne.s32.totalorder %s2340_s12, 0 }
  0xed   : > { %v419_v0 = vld [vmem:[%s1974_s6] sm:$0xff] (!%p980_p1)  ;;  %v420_v1 = vld [vmem:[%s1974_s6 + $0x8] sm:$0xff] (!%p980_p1)  ;;  %v421_v2 = vld [vmem:[%s1974_s6 + $0x10] sm:$0xff] (!%p980_p1) }
  0xee   : > { %418 = sbr.rel (%p980_p1) target bundleno = 246 (0xf6), region = 64  ;;  %435 = vst [vmem:[#allocation2] sm:$0xff] (!%p980_p1), %v419_v0  ;;  %436 = vst [vmem:[#allocation2 + $0x8] sm:$0xff] (!%p980_p1), %v420_v1  ;;  %v422_v3 = vld [vmem:[%s1974_s6 + $0x18] sm:$0xff] (!%p980_p1)  ;;  %v423_v4 = vld [vmem:[%s1974_s6 + $0x20] sm:$0xff] (!%p980_p1) }
  0xef   : > { %437 = vst [vmem:[#allocation2 + $0x10] sm:$0xff] (!%p980_p1), %v421_v2  ;;  %v424_v5 = vld [vmem:[%s1974_s6 + $0x28] sm:$0xff] (!%p980_p1)  ;;  %438 = vst [vmem:[#allocation2 + $0x18] sm:$0xff] (!%p980_p1), %v422_v3  ;;  %v425_v6 = vld [vmem:[%s1974_s6 + $0x30] sm:$0xff] (!%p980_p1) }
  0xf0   : > { %439 = vst [vmem:[#allocation2 + $0x20] sm:$0xff] (!%p980_p1), %v423_v4  ;;  %440 = vst [vmem:[#allocation2 + $0x28] sm:$0xff] (!%p980_p1), %v424_v5  ;;  %v426_v7 = vld [vmem:[%s1974_s6 + $0x38] sm:$0xff] (!%p980_p1)  ;;  %v427_v8 = vld [vmem:[%s1974_s6 + $0x40] sm:$0xff] (!%p980_p1) }
  0xf1   : > { %441 = vst [vmem:[#allocation2 + $0x30] sm:$0xff] (!%p980_p1), %v425_v6  ;;  %442 = vst [vmem:[#allocation2 + $0x38] sm:$0xff] (!%p980_p1), %v426_v7  ;;  %v428_v9 = vld [vmem:[%s1974_s6 + $0x48] sm:$0xff] (!%p980_p1)  ;;  %v429_v10 = vld [vmem:[%s1974_s6 + $0x50] sm:$0xff] (!%p980_p1) }
  0xf2   : > { %443 = vst [vmem:[#allocation2 + $0x40] sm:$0xff] (!%p980_p1), %v427_v8  ;;  %v430_v11 = vld [vmem:[%s1974_s6 + $0x58] sm:$0xff] (!%p980_p1)  ;;  %444 = vst [vmem:[#allocation2 + $0x48] sm:$0xff] (!%p980_p1), %v428_v9  ;;  %v431_v12 = vld [vmem:[%s1974_s6 + $0x60] sm:$0xff] (!%p980_p1) }
  0xf3   : > { %445 = vst [vmem:[#allocation2 + $0x50] sm:$0xff] (!%p980_p1), %v429_v10  ;;  %446 = vst [vmem:[#allocation2 + $0x58] sm:$0xff] (!%p980_p1), %v430_v11  ;;  %v432_v13 = vld [vmem:[%s1974_s6 + $0x68] sm:$0xff] (!%p980_p1)  ;;  %v433_v14 = vld [vmem:[%s1974_s6 + $0x70] sm:$0xff] (!%p980_p1) }
  0xf4   : > { %447 = vst [vmem:[#allocation2 + $0x60] sm:$0xff] (!%p980_p1), %v431_v12  ;;  %448 = vst [vmem:[#allocation2 + $0x68] sm:$0xff] (!%p980_p1), %v432_v13  ;;  %v434_v15 = vld [vmem:[%s1974_s6 + $0x78] sm:$0xff] (!%p980_p1) }
  0xf5   : > { %449 = vst [vmem:[#allocation2 + $0x70] sm:$0xff] %v433_v14  ;;  %450 = vst [vmem:[#allocation2 + $0x78] sm:$0xff] %v434_v15 }
  0xf6 PF: > { %v1219_v16 = vld [vmem:[%s1991_s9] sm:$0xff]   ;;  %v1220_v17 = vld [vmem:[%s1991_s9 + $0x8] sm:$0xff]   ;;  %v1221_v18 = vld [vmem:[%s1991_s9 + $0x10] sm:$0xff]   ;;  %s2341_s28 = sld [smem:[#allocation20_spill]] }
  0xf7   : > { %1017 = vmatprep.subr.bf16.mxu0 %v1219_v16  ;;  %1049 = vmatprep.subr.bf16.mxu1 %v1219_v16  ;;  %v1222_v19 = vld [vmem:[%s1991_s9 + $0x18] sm:$0xff]   ;;  %v2024_v21 = vld [vmem:[#allocation2 + $0x8] sm:$0xff]  ;;  %v1225_v28 = vld [vmem:[%s1991_s9 + $0x30] sm:$0xff]  }
  0xf8   : > { %1018 = vmatpush3.bf16.msra.mxu0 %v1219_v16  ;;  %1057 = vmatpush3.bf16.msra.mxu1 %v1219_v16  ;;  %v2022_v20 = vld [vmem:[#allocation2] sm:$0xff]  ;;  %v1224_v27 = vld [vmem:[%s1991_s9 + $0x28] sm:$0xff]   ;;  %v2040_v31 = vld [vmem:[#allocation2 + $0x18] sm:$0xff] }
  0xf9   : > { %1019 = vmatprep.subr.bf16.mxu0 %v1220_v17  ;;  %1050 = vmatprep.subr.bf16.mxu1 %v1220_v17  ;;  %v467_v23 = vpack.c.bf16 %v2024_v21, %v2022_v20  ;;  %v1223_v26 = vld [vmem:[%s1991_s9 + $0x20] sm:$0xff]   ;;  %v1226_v29 = vld [vmem:[%s1991_s9 + $0x38] sm:$0xff]   ;;  %v2038_v30 = vld [vmem:[#allocation2 + $0x10] sm:$0xff] }
  0xfa   : > { %v2026_v22 = vld [vmem:[#allocation2 + $0x40] sm:$0xff]  ;;  %v2030_v24 = vld [vmem:[#allocation2 + $0x48] sm:$0xff]  ;;  %v468_v38 = vpack.c.bf16 %v2040_v31, %v2038_v30  ;;  %v2062_v42 = vld [vmem:[#allocation2 + $0x30] sm:$0xff] }
  0xfb   : > { %v471_v25 = vpack.c.bf16 %v2030_v24, %v2026_v22  ;;  %1033 = vmatprep.mubr.bf16.mxu0 %v467_v23  ;;  %v2042_v32 = vld [vmem:[#allocation2 + $0x50] sm:$0xff]  ;;  %v2044_v33 = vld [vmem:[#allocation2 + $0x58] sm:$0xff]  ;;  %v2046_v34 = vld [vmem:[#allocation2 + $0x20] sm:$0xff] }
  0xfc   : > { %1020 = vmatpush3.bf16.msra.mxu0 %v1220_v17  ;;  %1058 = vmatpush3.bf16.msra.mxu1 %v1220_v17  ;;  %v2048_v35 = vld [vmem:[#allocation2 + $0x28] sm:$0xff]  ;;  %v2050_v36 = vld [vmem:[#allocation2 + $0x60] sm:$0xff]  ;;  %v472_v39 = vpack.c.bf16 %v2044_v33, %v2042_v32  ;;  %v2064_v43 = vld [vmem:[#allocation2 + $0x38] sm:$0xff]  ;;  %p992_p13 = scmp.ne.s32.totalorder %s2341_s28, 2 }
  0xfd   : > { %1021 = vmatprep.subr.bf16.mxu0 %v1221_v18  ;;  %1051 = vmatprep.subr.bf16.mxu1 %v1221_v18  ;;  %v2052_v37 = vld [vmem:[#allocation2 + $0x68] sm:$0xff]  ;;  %v469_v40 = vpack.c.bf16 %v2048_v35, %v2046_v34  ;;  %v2066_v44 = vld [vmem:[#allocation2 + $0x70] sm:$0xff]  ;;  %v2068_v45 = vld [vmem:[#allocation2 + $0x78] sm:$0xff]  ;;  %v470_v46 = vpack.c.bf16 %v2064_v43, %v2062_v42 }
  0xfe   : > { %1041 = vmatprep.mubr.bf16.mxu1 %v471_v25  ;;  %v473_v41 = vpack.c.bf16 %v2052_v37, %v2050_v36  ;;  %v474_v47 = vpack.c.bf16 %v2068_v45, %v2066_v44  ;;  %v2075_v48 = vld [vmem:[%s1997_s7] ss:$0 sm:$0xff] }
  0xff   : > { %v2078_v50 = vld [vmem:[%s1982_s15] ss:$0 sm:$0xff] }
 0x100   : > { %1022 = vmatpush3.bf16.msra.mxu0 %v1221_v18  ;;  %1059 = vmatpush3.bf16.msra.mxu1 %v1221_v18  ;;  %v2083_v56 = vld [vmem:[%s1989_s22] ss:$0 sm:$0xff] }
 0x101   : > { %1023 = vmatprep.subr.bf16.mxu0 %v1222_v19  ;;  %1052 = vmatprep.subr.bf16.mxu1 %v1222_v19 }
 0x104   : > { %1024 = vmatpush3.bf16.msra.mxu0 %v1222_v19  ;;  %1060 = vmatpush3.bf16.msra.mxu1 %v1222_v19 }
 0x105   : > { %1025 = vmatprep.subr.bf16.mxu0 %v1223_v26  ;;  %1053 = vmatprep.subr.bf16.mxu1 %v1223_v26 }
 0x108   : > { %1026 = vmatpush3.bf16.msra.mxu0 %v1223_v26  ;;  %1061 = vmatpush3.bf16.msra.mxu1 %v1223_v26 }
 0x109   : > { %1027 = vmatprep.subr.bf16.mxu0 %v1224_v27  ;;  %1054 = vmatprep.subr.bf16.mxu1 %v1224_v27 }
 0x10c   : > { %1028 = vmatpush3.bf16.msra.mxu0 %v1224_v27  ;;  %1062 = vmatpush3.bf16.msra.mxu1 %v1224_v27 }
 0x10d   : > { %1029 = vmatprep.subr.bf16.mxu0 %v1225_v28  ;;  %1055 = vmatprep.subr.bf16.mxu1 %v1225_v28 }
 0x110   : > { %1030 = vmatpush3.bf16.msra.mxu0 %v1225_v28  ;;  %1063 = vmatpush3.bf16.msra.mxu1 %v1225_v28 }
 0x111   : > { %1031 = vmatprep.subr.bf16.mxu0 %v1226_v29  ;;  %1056 = vmatprep.subr.bf16.mxu1 %v1226_v29 }
 0x114   : > { %1032 = vmatpush3.bf16.msra.mxu0 %v1226_v29  ;;  %1064 = vmatpush3.bf16.msra.mxu1 %v1226_v29 }
 0x117   : > { %1034 = vmatmul.mubr.bf16.vlgmr.msra.gmra.mrb[0].mxu0 %v468_v38  ;;  %1042 = vmatmul.mubr.bf16.vlgmr.msra.gmra.mrb[0].mxu1 %v472_v39 }
 0x118   : > { %1037 = vmatprep.mubr.bf16.mxu0 %v469_v40  ;;  %1045 = vmatprep.mubr.bf16.mxu1 %v473_v41 }
 0x11f   : > { %1038 = vmatmul.mubr.bf16.gmra.mrb[4].mxu0 %v470_v46  ;;  %1046 = vmatmul.mubr.bf16.gmra.mrb[4].mxu1 %v474_v47 }
 0x1ea   : > { %v1035_v49 = vpop.f32.mrb[0].mxu0  ;;  %v1043_v51 = vpop.f32.mrb[0].mxu1 }
 0x1eb   : > { %v589_v52 = vadd.f32 %v1035_v49, %v2075_v48  ;;  %v621_v53 = vadd.f32 %v1043_v51, %v2075_v48  ;;  %v580_v54 = vpop.f32.mrb[1].mxu0  ;;  %v612_v55 = vpop.f32.mrb[1].mxu1 }
 0x1ec   : > { %v581_v57 = vadd.f32 %v2075_v48, %v580_v54  ;;  %v613_v58 = vadd.f32 %v2075_v48, %v612_v55  ;;  %v1036_v59 = vpop.f32.mrb[2].mxu0  ;;  %v1044_v60 = vpop.f32.mrb[2].mxu1 }
 0x1ed   : > { %v653_v61 = vmul.f32 %v2078_v50, %v589_v52  ;;  %v661_v62 = vmul.f32 %v2078_v50, %v621_v53  ;;  %v592_v63 = vadd.f32 %v1036_v59, %v2075_v48  ;;  %v624_v0 = vadd.f32 %v1044_v60, %v2075_v48  ;;  %v583_v1 = vpop.f32.mrb[3].mxu0  ;;  %v615_v2 = vpop.f32.mrb[3].mxu1 }
 0x1ee   : > { %v651_v3 = vmul.f32 %v2078_v50, %v581_v57  ;;  %v659_v4 = vmul.f32 %v2078_v50, %v613_v58  ;;  %v584_v5 = vadd.f32 %v2075_v48, %v583_v1  ;;  %v616_v6 = vadd.f32 %v2075_v48, %v615_v2 }
 0x1ef   : > { %v675_v7 = vadd.f32 %v2083_v56, %v653_v61  ;;  %v683_v8 = vadd.f32 %v2083_v56, %v661_v62  ;;  %v654_v9 = vmul.f32 %v2078_v50, %v592_v63  ;;  %v662_v10 = vmul.f32 %v2078_v50, %v624_v0 }
 0x1f0   : > { %v673_v11 = vadd.f32 %v2083_v56, %v651_v3  ;;  %v681_v12 = vadd.f32 %v2083_v56, %v659_v4  ;;  %v652_v13 = vmul.f32 %v2078_v50, %v584_v5  ;;  %v660_v14 = vmul.f32 %v2078_v50, %v616_v6 }
 0x1f1   : > { %1227 = vtanh.f32 %v675_v7  ;;  %v676_v15 = vadd.f32 %v2083_v56, %v654_v9  ;;  %v684_v16 = vadd.f32 %v2083_v56, %v662_v10 }
 0x1f2   : > { %1229 = vtanh.f32 %v683_v8  ;;  %v1039_v17 = vpop.f32.mrb[4].mxu0  ;;  %v1047_v18 = vpop.f32.mrb[4].mxu1  ;;  %v674_v19 = vadd.f32 %v2083_v56, %v652_v13  ;;  %v682_v28 = vadd.f32 %v2083_v56, %v660_v14 }
 0x1f3   : > { %1231 = vtanh.f32 %v673_v11  ;;  %v605_v23 = vadd.f32 %v1039_v17, %v2075_v48  ;;  %v637_v25 = vadd.f32 %v1047_v18, %v2075_v48  ;;  %v596_v26 = vpop.f32.mrb[5].mxu0  ;;  %v628_v27 = vpop.f32.mrb[5].mxu1 }
 0x1f4   : > { %1233 = vtanh.f32 %v681_v12  ;;  %v597_v29 = vadd.f32 %v2075_v48, %v596_v26  ;;  %v629_v38 = vadd.f32 %v2075_v48, %v628_v27  ;;  %v1040_v39 = vpop.f32.mrb[6].mxu0  ;;  %v1048_v40 = vpop.f32.mrb[6].mxu1 }
 0x1f5   : > { %1235 = vtanh.f32 %v676_v15  ;;  %v657_v41 = vmul.f32 %v2078_v50, %v605_v23  ;;  %v665_v46 = vmul.f32 %v2078_v50, %v637_v25  ;;  %v608_v47 = vadd.f32 %v1040_v39, %v2075_v48  ;;  %v599_v49 = vpop.f32.mrb[7].mxu0  ;;  %v631_v51 = vpop.f32.mrb[7].mxu1 }
 0x1f6   : > { %1237 = vtanh.f32 %v684_v16  ;;  %v655_v52 = vmul.f32 %v2078_v50, %v597_v29  ;;  %v663_v53 = vmul.f32 %v2078_v50, %v629_v38  ;;  %v640_v54 = vadd.f32 %v1048_v40, %v2075_v48 }
 0x1f7   : > { %1239 = vtanh.f32 %v674_v19  ;;  %v679_v55 = vadd.f32 %v2083_v56, %v657_v41  ;;  %v687_v57 = vadd.f32 %v2083_v56, %v665_v46  ;;  %v658_v58 = vmul.f32 %v2078_v50, %v608_v47 }
 0x1f8   : > { %1241 = vtanh.f32 %v682_v28  ;;  %v677_v59 = vadd.f32 %v2083_v56, %v655_v52  ;;  %v685_v60 = vadd.f32 %v2083_v56, %v663_v53  ;;  %v666_v61 = vmul.f32 %v2078_v50, %v640_v54 }
 0x1f9   : > { %1243 = vtanh.f32 %v679_v55  ;;  %v680_v62 = vadd.f32 %v2083_v56, %v658_v58  ;;  %v600_v63 = vadd.f32 %v2075_v48, %v599_v49  ;;  %v632_v0 = vadd.f32 %v2075_v48, %v631_v51 }
 0x1fa   : > { %1245 = vtanh.f32 %v687_v57  ;;  %v688_v1 = vadd.f32 %v2083_v56, %v666_v61 }
 0x1fb   : > { %v1228_v2 = vpop.eup %1227  ;;  %1247 = vtanh.f32 %v677_v59  ;;  %v656_v3 = vmul.f32 %v2078_v50, %v600_v63  ;;  %v664_v4 = vmul.f32 %v2078_v50, %v632_v0 }
 0x1fc   : > { %v1230_v5 = vpop.eup %1229  ;;  %v707_v6 = vadd.f32 %v1228_v2, %v2038_v30  ;;  %1249 = vtanh.f32 %v685_v60 }
 0x1fd   : > { %v1232_v7 = vpop.eup %1231  ;;  %v715_v8 = vadd.f32 %v1230_v5, %v2042_v32  ;;  %1251 = vtanh.f32 %v680_v62  ;;  %v678_v9 = vadd.f32 %v2083_v56, %v656_v3  ;;  %v686_v48 = vadd.f32 %v2083_v56, %v664_v4 }
 0x1fe   : > { %v1234_v10 = vpop.eup %1233  ;;  %723 = vst [vmem:[#allocation2 + $0x10] sm:$0xff] %v707_v6  ;;  %v705_v11 = vadd.f32 %v1232_v7, %v2022_v20  ;;  %1253 = vtanh.f32 %v688_v1 }
 0x1ff   : > { %v1236_v12 = vpop.eup %1235  ;;  %731 = vst [vmem:[#allocation2 + $0x50] sm:$0xff] %v715_v8  ;;  %v713_v50 = vadd.f32 %v1234_v10, %v2026_v22  ;;  %1255 = vtanh.f32 %v678_v9 }
 0x200   : > { %v1238_v30 = vpop.eup %1237  ;;  %721 = vst [vmem:[#allocation2] sm:$0xff] %v705_v11  ;;  %v708_v13 = vadd.f32 %v1236_v12, %v2040_v31  ;;  %1257 = vtanh.f32 %v686_v48 }
 0x201   : > { %v1240_v32 = vpop.eup %1239  ;;  %729 = vst [vmem:[#allocation2 + $0x40] sm:$0xff] %v713_v50  ;;  %v716_v14 = vadd.f32 %v1238_v30, %v2044_v33 }
 0x202   : > { %v1242_v56 = vpop.eup %1241  ;;  %724 = vst [vmem:[#allocation2 + $0x18] sm:$0xff] %v708_v13  ;;  %v706_v15 = vadd.f32 %v1240_v32, %v2024_v21 }
 0x203   : > { %v1244_v20 = vpop.eup %1243  ;;  %732 = vst [vmem:[#allocation2 + $0x58] sm:$0xff] %v716_v14  ;;  %v714_v16 = vadd.f32 %v1242_v56, %v2030_v24 }
 0x204   : > { %v1246_v17 = vpop.eup %1245  ;;  %722 = vst [vmem:[#allocation2 + $0x8] sm:$0xff] %v706_v15  ;;  %v711_v22 = vadd.f32 %v1244_v20, %v2062_v42 }
 0x205   : > { %v1248_v18 = vpop.eup %1247  ;;  %730 = vst [vmem:[#allocation2 + $0x48] sm:$0xff] %v714_v16  ;;  %v719_v31 = vadd.f32 %v1246_v17, %v2066_v44 }
 0x206   : > { %v1250_v19 = vpop.eup %1249  ;;  %727 = vst [vmem:[#allocation2 + $0x30] sm:$0xff] %v711_v22  ;;  %v709_v33 = vadd.f32 %v1248_v18, %v2046_v34  ;;  %v751_v41 = vld [vmem:[#allocation2 + $0x50] sm:$0xff] (!%p992_p13) }
 0x207   : > { %v1252_v23 = vpop.eup %1251  ;;  %735 = vst [vmem:[#allocation2 + $0x70] sm:$0xff] %v719_v31  ;;  %v717_v21 = vadd.f32 %v1250_v19, %v2050_v36  ;;  %740 = sbr.rel (%p992_p13) target bundleno = 534 (0x216), region = 68  ;;  %v741_v34 = vld [vmem:[#allocation2] sm:$0xff] (!%p992_p13)  ;;  %767 = vst [vmem:[%s1999_s5 + $0x50] sm:$0xff] (!%p992_p13), %v751_v41 }
 0x208   : > { %v1254_v25 = vpop.eup %1253  ;;  %725 = vst [vmem:[#allocation2 + $0x20] sm:$0xff] %v709_v33  ;;  %v712_v24 = vadd.f32 %v1252_v23, %v2064_v43  ;;  %757 = vst [vmem:[%s1999_s5] sm:$0xff] (!%p992_p13), %v741_v34  ;;  %v749_v39 = vld [vmem:[#allocation2 + $0x40] sm:$0xff] (!%p992_p13) }
 0x209   : > { %v1256_v26 = vpop.eup %1255  ;;  %733 = vst [vmem:[#allocation2 + $0x60] sm:$0xff] %v717_v21  ;;  %v720_v42 = vadd.f32 %v1254_v25, %v2068_v45  ;;  %765 = vst [vmem:[%s1999_s5 + $0x40] sm:$0xff] (!%p992_p13), %v749_v39 }
 0x20a   : > { %v1258_v27 = vpop.eup %1257  ;;  %728 = vst [vmem:[#allocation2 + $0x38] sm:$0xff] %v712_v24  ;;  %v710_v44 = vadd.f32 %v1256_v26, %v2048_v35  ;;  %v743_v35 = vld [vmem:[#allocation2 + $0x10] sm:$0xff] (!%p992_p13)  ;;  %v752_v46 = vld [vmem:[#allocation2 + $0x58] sm:$0xff] (!%p992_p13) }
 0x20b   : > { %736 = vst [vmem:[#allocation2 + $0x78] sm:$0xff] %v720_v42  ;;  %v718_v28 = vadd.f32 %v1258_v27, %v2052_v37  ;;  %v742_v36 = vld [vmem:[#allocation2 + $0x8] sm:$0xff] (!%p992_p13)  ;;  %759 = vst [vmem:[%s1999_s5 + $0x10] sm:$0xff] (!%p992_p13), %v743_v35  ;;  %v744_v37 = vld [vmem:[#allocation2 + $0x18] sm:$0xff] (!%p992_p13) }
 0x20c   : > { %726 = vst [vmem:[#allocation2 + $0x28] sm:$0xff] %v710_v44  ;;  %758 = vst [vmem:[%s1999_s5 + $0x8] sm:$0xff] (!%p992_p13), %v742_v36  ;;  %v750_v40 = vld [vmem:[#allocation2 + $0x48] sm:$0xff] (!%p992_p13) }
 0x20d   : > { %734 = vst [vmem:[#allocation2 + $0x68] sm:$0xff] %v718_v28  ;;  %760 = vst [vmem:[%s1999_s5 + $0x18] sm:$0xff] (!%p992_p13), %v744_v37  ;;  %v747_v29 = vld [vmem:[#allocation2 + $0x30] sm:$0xff] (!%p992_p13) }
 0x20e   : > { %763 = vst [vmem:[%s1999_s5 + $0x30] sm:$0xff] %v747_v29  ;;  %766 = vst [vmem:[%s1999_s5 + $0x48] sm:$0xff] %v750_v40  ;;  %v755_v51 = vld [vmem:[#allocation2 + $0x70] sm:$0xff] }
 0x20f   : > { %v745_v43 = vld [vmem:[#allocation2 + $0x20] sm:$0xff]  ;;  %768 = vst [vmem:[%s1999_s5 + $0x58] sm:$0xff] %v752_v46  ;;  %771 = vst [vmem:[%s1999_s5 + $0x70] sm:$0xff] %v755_v51 }
 0x210   : > { %761 = vst [vmem:[%s1999_s5 + $0x20] sm:$0xff] %v745_v43  ;;  %v753_v47 = vld [vmem:[#allocation2 + $0x60] sm:$0xff] }
 0x211   : > { %v748_v38 = vld [vmem:[#allocation2 + $0x38] sm:$0xff]  ;;  %769 = vst [vmem:[%s1999_s5 + $0x60] sm:$0xff] %v753_v47 }
 0x212   : > { %764 = vst [vmem:[%s1999_s5 + $0x38] sm:$0xff] %v748_v38  ;;  %v756_v52 = vld [vmem:[#allocation2 + $0x78] sm:$0xff] }
 0x213   : > { %v746_v45 = vld [vmem:[#allocation2 + $0x28] sm:$0xff]  ;;  %772 = vst [vmem:[%s1999_s5 + $0x78] sm:$0xff] %v756_v52 }
 0x214   : > { %762 = vst [vmem:[%s1999_s5 + $0x28] sm:$0xff] %v746_v45  ;;  %v754_v49 = vld [vmem:[#allocation2 + $0x68] sm:$0xff] }
 0x215   : > { %770 = vst [vmem:[%s1999_s5 + $0x68] sm:$0xff] %v754_v49 }
 0x216 PF: > { %s2342_s3 = sld [smem:[#allocation21_spill]]  ;;  %s2343_s18 = sld [smem:[#allocation30_spill]] }
 0x217   : > { %s2344_s11 = sld [smem:[#allocation36_spill]]  ;;  %s789_s6 = sshll.u32 %s1999_s5, 4  ;;  %s2171_s6 = int_to_ptr.vmem [resolvable:$true] %s789_s6 }
 0x218   : > { %s774_s17 = scalar_lea.sflag [#allocation5], %s1970_s0  ;;  %s1409_s8 = scalar_lea.vmem %s2171_s6, 2048 }
 0x219   : > { %p1410_p3 = scmp.ne.s32.totalorder %s2171_s6, %s1409_s8  ;;  %s1574_s4 = smov [#allocation12]  }
 0x21a   : > { %s1413_s14 = sshll.u32 %s1574_s4, 4  ;;  %s1414_s14 = int_to_ptr.vmem [resolvable:$false] %s1413_s14 }
 0x21b   : > { %s1415_s13 = scalar_lea.vmem %s1414_s14, 4096  ;;  %p1416_p8 = scmp.lt.s32.totalorder %s2171_s6, %s1414_s14 }
 0x21c   : > { %s1000_s26 = sshll.u32 %s2342_s3, 11  ;;  %p2345_p0 = scmp.ne.s32.totalorder %s2343_s18, 0 }
 0x21d   : > { %s2168_s24 = scalar_lea.hbm %s2344_s11, %s1000_s26  ;;  %p1417_p6 = scmp.lt.s32.totalorder %s1415_s13, %s1409_s8 }
 0x21e   : > { %p1411_p7 = pnand %p1410_p3, %p2345_p0 }
 0x21f   : > { %p1418_p2 = por %p1417_p6, %p1416_p8 }
 0x220   : > { %p1412_p5 = pneg %p1411_p7 }
 0x222   : > { %p1419_p12 = pnand %p1418_p2, %p1412_p5 }
 0x224   : > { %1422 = shalt.err (!%p1419_p12)
}
 0x225   : > { %s1423_s15 = scalar_lea.hbm %s2168_s24, 2048  ;;  %s1427_s22 = scalar_lea.hbm %s2344_s11, 4096 }
 0x226   : > { %p1424_p10 = scmp.ne.s32.totalorder %s2168_s24, %s1423_s15  ;;  %p1428_p11 = scmp.lt.u32.totalorder %s2168_s24, %s2344_s11 }
 0x227   : > { %p1429_p1 = scmp.lt.u32.totalorder %s1427_s22, %s1423_s15  ;;  %p1431_p3 = scmp.lt.u32.totalorder %s1423_s15, %s2168_s24 }
 0x228   : > { %p1425_p4 = pnand %p1424_p10, %p2345_p0 }
 0x229   : > { %p1430_p13 = por %p1429_p1, %p1428_p11 }
 0x22a   : > { %p1426_p9 = pneg %p1425_p4 }
 0x22b   : > { %p1432_p7 = por %p1431_p3, %p1430_p13 }
 0x22d   : > { %p1433_p5 = pnand %p1432_p7, %p1426_p9 }
 0x22f   : > { %1436 = shalt.err (!%p1433_p5)
}
 0x230   : > { %s1575_s7 = smov 128   ;;  %s1576_s5 = smov 8  }
 0x231   : > { %1077 = dma.vmem_to_hbm [thread:$0]  (%p2345_p0), %s2171_s6, 2048, %s2168_s24, %s774_s17, %s1575_s7, %s1575_s7, %s1576_s5  }
 0x232 PF: > { %s2346_s12 = sld [smem:[#allocation23_spill]]  ;;  %s2347_s28 = sld [smem:[#allocation18_spill]] }
 0x233   : > { %s2348_s3 = sld [smem:[#allocation31_spill]] }
 0x238   : > { %p1100_p8 = scmp.ge.s32.totalorder %s2346_s12, 2  ;;  %s804_s26 = sand.u32 1, %s2347_s28  }
 0x239   : > { %p2349_p6 = scmp.ne.s32.totalorder %s2348_s3, 0  ;;  %s805_s30 = scalar_lea.sflag [#allocation5], %s804_s26 }
 0x23b   : > { %p1096_p2 = pnand %p1100_p8, %p2349_p6 }
 0x23d   : > { %1506 = dma.done.wait (!%p1096_p2), %s805_s30, 2048  }
 0x23e   : > { %1508 = vsyncadd (!%p1096_p2), %s805_s30, 4294965248  ;;  %s27_s6 = sadd.s32 1, %s2346_s12   ;;  %s2351_s0 = sld [smem:[#allocation28_spill]] }
 0x23f   : > { %p2202_p12 = scmp.ge.s32.totalorder %s27_s6, 8   ;;  %s2352_s21 = sld [smem:[#allocation17_spill]] }
 0x240   : > { %s2353_s24 = sld [smem:[#allocation27_spill]]  ;;  %s2354_s17 = sld [smem:[#allocation19_spill]] }
 0x241   : > { %s2355_s26 = sld [smem:[#allocation29_spill]]  ;;  %s2356_s28 = sld [smem:[#allocation22_spill]] }
 0x242   : > { %s2357_s8 = sld [smem:[#allocation24_spill]]  ;;  %s2358_s30 = sld [smem:[#allocation25_spill]] }
 0x243   : > { %s2359_s18 = smov %s1515_s19  ;;  %s2360_s19 = smov %s1519_s20 }
 0x244   : > { %s2361_s20 = smov %s2351_s0  ;;  %s2362_s22 = smov %s1531_s23 }
 0x245   : > { %s2366_s27 = smov %s1555_s29  ;;  %26 = sbr.rel (!%p2202_p12) target bundleno = 20 (0x14), region = 141 }
 0x246   : > { %s2363_s23 = smov %s2353_s24  ;;  %s2364_s24 = smov %s1539_s25 }
 0x247   : > { %s2365_s25 = smov %s2354_s17 }
 0x248   : > { %s2367_s29 = smov %s2357_s8 }
 0x24c   :  { %810 = vsyncpa [#allocation4], 1 }
 0x24d   :  { %812 = vsyncpa [#allocation4 + $0x1], 1 }
 0x24e   :  { %813 = vsyncpa [#allocation7], 1 }
 0x24f   :  { %815 = vsyncpa [#allocation7 + $0x1], 1 }
 0x250   :  { %816 = vsyncpa [#allocation10], 1 }
 0x251   :  { %818 = vsyncpa [#allocation10 + $0x1], 1 }
 0x252   :  { %819 = vsyncpa [#allocation5], 1 }
 0x253   :  { %821 = vsyncpa [#allocation5 + $0x1], 1 }

</bundles_post_ra>
